<compile_context>
chip_gen: v7x
topology: tpu7x:2x2x1
jax: 0.10.0
libtpu: 0.0.40
codegen_flags: <defaults>
</compile_context>

<pallas_src>
import jax
import jax.numpy as jnp
from jax.experimental import pallas as pl
from jax.experimental.pallas import tpu as pltpu


# ----------------------------------------------------------------------------
# Fused pooling + excitation kernel.
# ----------------------------------------------------------------------------
def _make_kernel(hw: int, hw_tile: int, masked: bool, inv_hw: float):
    def kernel(x_ref, w1_ref, w2_ref, o_ref, sum_acc, max_acc):
        # x_ref : (1, C, T) native dtype   w1_ref: (C, Cr)   w2_ref: (Cr, C)
        # o_ref : (1, 1, C)                sum_acc/max_acc: (C, T) f32 scratch
        t = pl.program_id(1)
        n_t = pl.num_programs(1)

        @pl.when(t == 0)
        def _init():
            sum_acc[...] = jnp.zeros(sum_acc.shape, jnp.float32)
            max_acc[...] = jnp.full(max_acc.shape, -jnp.inf, jnp.float32)

        x = x_ref[0].astype(jnp.float32)        # (C, T); cast hidden under DMA

        if masked:
            # Only the last (ragged) tile pays the iota/compare/select cost.
            @pl.when(t < n_t - 1)
            def _hot():
                sum_acc[...] += x
                max_acc[...] = jnp.maximum(max_acc[...], x)

            @pl.when(t == n_t - 1)
            def _tail():
                col = t * hw_tile + jax.lax.broadcasted_iota(jnp.int32, x.shape, 1)
                valid = col < hw
                sum_acc[...] += jnp.where(valid, x, 0.0)
                max_acc[...] = jnp.maximum(max_acc[...],
                                           jnp.where(valid, x, -jnp.inf))
        else:
            sum_acc[...] += x
            max_acc[...] = jnp.maximum(max_acc[...], x)

        @pl.when(t == n_t - 1)
        def _finalize():
            # One-time cross-lane reduce (XLU), then the fused excitation MLP.
            s = jnp.sum(sum_acc[...], axis=1)            # (C,)
            m = jnp.max(max_acc[...], axis=1)            # (C,)
            c = s.shape[0]
            avg = (s * jnp.float32(inv_hw)).reshape(1, c)
            y = jnp.concatenate([avg, m.reshape(1, c)], axis=0)      # (2, C)
            h = jnp.dot(y, w1_ref[...], preferred_element_type=jnp.float32)
            h = jnp.maximum(h, 0.0)                                   # (2, Cr)
            z = jnp.dot(h, w2_ref[...], preferred_element_type=jnp.float32)  # (2, C)
            gate = jax.nn.sigmoid(z[0:1] + z[1:2])                    # (1, C)
            o_ref[...] = gate.reshape(1, 1, c).astype(o_ref.dtype)

    return kernel


# ----------------------------------------------------------------------------
# Tiling / VMEM heuristics.
# ----------------------------------------------------------------------------
def _pick_hw_tile(c: int, hw: int, itemsize: int,
                  tile_budget_bytes: int = 4 * 1024 * 1024) -> int:
    """Largest lane-dense (multiple-of-128) spatial tile whose input block fits
    the per-buffer budget; tiny inputs take the whole spatial extent."""
    if hw <= 128:
        return hw
    max_t = max(tile_budget_bytes // (c * itemsize), 128)
    t = min((hw // 128) * 128, max_t)
    return max((t // 128) * 128, 128)


def _vmem_limit_bytes() -> int:
    cap = 64 * 1024 * 1024  # conservative default (v7x physical VMEM per TC)
    try:
        cap = int(getattr(pltpu.get_tpu_info(), "vmem_capacity_bytes", cap))
    except Exception:
        pass
    # Leave compiler-scratch headroom; 48 MiB is safe on v5e/v6e (128 MiB) and v7x (64 MiB).
    return int(min(48 * 1024 * 1024, (cap * 3) // 4))


# ----------------------------------------------------------------------------
# Wrapper
# ----------------------------------------------------------------------------
@jax.jit
def channel_attention_pallas(x_nchw, fc1_w, fc2_w):
    """ChannelAttention forward.

    x_nchw : (B, C, H, W)        any float dtype; streamed in its native dtype
    fc1_w  : (C // ratio, C)     == Conv2d(C, C//r, 1, bias=False).weight[:, :, 0, 0]
    fc2_w  : (C, C // ratio)     == Conv2d(C//r, C, 1, bias=False).weight[:, :, 0, 0]
    returns: (B, C, 1, 1) sigmoid gate in x's dtype.  Note: for bf16 inputs the
             f32-computed gate is truncated back to bf16 (PyTorch returns the
             compute dtype).
    """
    B, C, H, W = x_nchw.shape
    HW = H * W
    x = x_nchw.reshape(B, C, HW)          # no dtype copy: stream native dtype

    itemsize = x.dtype.itemsize
    T = _pick_hw_tile(C, HW, itemsize)
    n_t = pl.cdiv(HW, T)
    masked = (HW % T) != 0

    # Weights pre-transposed to (in, out) so the fused gate does plain y @ W.
    w1t = fc1_w.T.astype(jnp.float32)     # (C, Cr)
    w2t = fc2_w.T.astype(jnp.float32)     # (Cr, C)
    Cr = w1t.shape[1]

    x_index = lambda b, t: (b, 0, t)
    tile_bytes = C * T * itemsize
    if n_t > 2 and tile_bytes < (1 << 20):
        # Many tiny steps: a 3rd buffer hides per-step DMA issue latency.
        try:
            x_spec = pl.BlockSpec((1, C, T), x_index, pipeline_mode=pl.Buffered(3))
        except TypeError:  # older jax without pipeline_mode on BlockSpec
            x_spec = pl.BlockSpec((1, C, T), x_index)
    else:
        x_spec = pl.BlockSpec((1, C, T), x_index)

    gate = pl.pallas_call(
        _make_kernel(HW, T, masked, 1.0 / HW),
        out_shape=jax.ShapeDtypeStruct((B, 1, C), x_nchw.dtype),
        grid_spec=pltpu.PrefetchScalarGridSpec(
            num_scalar_prefetch=0,
            grid=(B, n_t),
            in_specs=[x_spec,
                      pl.BlockSpec((C, Cr), lambda b, t: (0, 0)),
                      pl.BlockSpec((Cr, C), lambda b, t: (0, 0))],
            out_specs=pl.BlockSpec((1, 1, C), lambda b, t: (b, 0, 0)),
            scratch_shapes=[pltpu.VMEM((C, T), jnp.float32),
                            pltpu.VMEM((C, T), jnp.float32)],
        ),
        compiler_params=pltpu.CompilerParams(
            dimension_semantics=("parallel", "arbitrary"),
            vmem_limit_bytes=_vmem_limit_bytes()),
    )(x, w1t, w2t)

    # (B, 1, C) -> (B, C, 1, 1) is a pure reshape (same element order).
    return gate.reshape(B, C, 1, 1)


# ----------------------------------------------------------------------------
# Pure-JAX reference matching the PyTorch module.
# ----------------------------------------------------------------------------
def channel_attention_ref(x, fc1_w, fc2_w):
    avg = jnp.mean(x, axis=(2, 3))     # (B, C)
    mx = jnp.max(x, axis=(2, 3))       # (B, C)

    def mlp(y):
        return jnp.maximum(y @ fc1_w.T, 0.0) @ fc2_w.T

    return jax.nn.sigmoid(mlp(avg) + mlp(mx))[:, :, None, None]


if __name__ == "__main__":
    key = jax.random.PRNGKey(0)
    ratio = 8  # module default

    # Case 1: canonical CBAM sizes, f32, spatial extent a multiple of 128.
    B, C, H, W = 2, 64, 16, 16
    Cr = C // ratio
    kx, k1, k2 = jax.random.split(key, 3)
    x = jax.random.normal(kx, (B, C, H, W), dtype=jnp.float32)
    fc1_w = jax.random.normal(k1, (Cr, C), dtype=jnp.float32) * 0.1
    fc2_w = jax.random.normal(k2, (C, Cr), dtype=jnp.float32) * 0.1

    out = channel_attention_pallas(x, fc1_w, fc2_w)
    jax.block_until_ready(out)
    ref = channel_attention_ref(x, fc1_w, fc2_w)
    assert out.shape == (B, C, 1, 1)
    assert jnp.allclose(out, ref, atol=1e-5, rtol=1e-5), "f32 mismatch vs reference"

    # Case 2: ragged spatial extent + bf16 input (exercises masked tail,
    # multi-tile reduction, and native-dtype streaming).
    B2, C2, H2, W2 = 1, 32, 15, 15
    Cr2 = C2 // ratio
    kx2, k3, k4 = jax.random.split(kx, 3)
    x2 = jax.random.normal(kx2, (B2, C2, H2, W2), dtype=jnp.float32).astype(jnp.bfloat16)
    fc1_w2 = jax.random.normal(k3, (Cr2, C2), dtype=jnp.float32) * 0.1
    fc2_w2 = jax.random.normal(k4, (C2, Cr2), dtype=jnp.float32) * 0.1

    out2 = channel_attention_pallas(x2, fc1_w2, fc2_w2)
    jax.block_until_ready(out2)
    ref2 = channel_attention_ref(x2.astype(jnp.float32), fc1_w2, fc2_w2)
    assert out2.shape == (B2, C2, 1, 1)
    assert jnp.allclose(out2.astype(jnp.float32), ref2, atol=2e-2), "bf16 mismatch vs reference"

    print("KERNEL_OK")
</pallas_src>

<mosaic_0001>
module attributes {stable_mosaic.version = 11 : i64} {
  func.func @kernel(%arg0: i32, %arg1: i32, %arg2: memref<1x64x256xf32, #tpu.memory_space<vmem>>, %arg3: memref<64x8xf32, #tpu.memory_space<vmem>>, %arg4: memref<8x64xf32, #tpu.memory_space<vmem>>, %arg5: memref<1x1x64xf32, #tpu.memory_space<vmem>>, %arg6: memref<64x256xf32, #tpu.memory_space<vmem>>, %arg7: memref<64x256xf32, #tpu.memory_space<vmem>>) attributes {dimension_semantics = [#tpu.dimension_semantics<parallel>, #tpu.dimension_semantics<arbitrary>], iteration_bounds = array<i64: 2, 1>, scalar_prefetch = 0 : i64, scratch_operands = 2 : i64, tpu.core_type = #tpu.core_type<tc>, window_params = [{transform_indices = @transform_0, window_bounds = array<i64: 1, 64, 256>}, {pipeline_mode = #tpu.pipeline_mode<synchronous>, transform_indices = @transform_1, window_bounds = array<i64: 64, 8>}, {pipeline_mode = #tpu.pipeline_mode<synchronous>, transform_indices = @transform_2, window_bounds = array<i64: 8, 64>}, {transform_indices = @transform_3, window_bounds = array<i64: 1, 1, 64>}]} {
    %c0_i32 = arith.constant 0 : i32
    %0 = arith.cmpi eq, %arg1, %c0_i32 : i32
    %1 = arith.extui %0 : i1 to i32
    %c0_i32_0 = arith.constant 0 : i32
    %2 = arith.cmpi ne, %1, %c0_i32_0 : i32
    scf.if %2 {
      %cst = arith.constant 0.000000e+00 : f32
      %14 = vector.broadcast %cst : f32 to vector<64x256xf32>
      %c0_13 = arith.constant 0 : index
      %c0_14 = arith.constant 0 : index
      %15 = vector.load %arg6[%c0_13, %c0_14] : memref<64x256xf32, #tpu.memory_space<vmem>>, vector<64x256xf32>
      tpu.vector_store %arg6[%c0_13, %c0_14], %14 {strides = array<i32>} : memref<64x256xf32, #tpu.memory_space<vmem>>, vector<64x256xf32>,
      %cst_15 = arith.constant 0xFF800000 : f32
      %16 = vector.broadcast %cst_15 : f32 to vector<64x256xf32>
      %c0_16 = arith.constant 0 : index
      %c0_17 = arith.constant 0 : index
      %17 = vector.load %arg7[%c0_16, %c0_17] : memref<64x256xf32, #tpu.memory_space<vmem>>, vector<64x256xf32>
      tpu.vector_store %arg7[%c0_16, %c0_17], %16 {strides = array<i32>} : memref<64x256xf32, #tpu.memory_space<vmem>>, vector<64x256xf32>,
    } else {
    }
    %c0 = arith.constant 0 : index
    %c0_1 = arith.constant 0 : index
    %c0_2 = arith.constant 0 : index
    %3 = vector.load %arg2[%c0, %c0_1, %c0_2] : memref<1x64x256xf32, #tpu.memory_space<vmem>>, vector<1x64x256xf32>
    %4 = vector.shape_cast %3 : vector<1x64x256xf32> to vector<64x256xf32>
    %c0_3 = arith.constant 0 : index
    %c0_4 = arith.constant 0 : index
    %5 = vector.load %arg6[%c0_3, %c0_4] : memref<64x256xf32, #tpu.memory_space<vmem>>, vector<64x256xf32>
    %6 = arith.addf %5, %4 : vector<64x256xf32>
    %c0_5 = arith.constant 0 : index
    %c0_6 = arith.constant 0 : index
    %7 = vector.load %arg6[%c0_5, %c0_6] : memref<64x256xf32, #tpu.memory_space<vmem>>, vector<64x256xf32>
    tpu.vector_store %arg6[%c0_5, %c0_6], %6 {strides = array<i32>} : memref<64x256xf32, #tpu.memory_space<vmem>>, vector<64x256xf32>,
    %c0_7 = arith.constant 0 : index
    %c0_8 = arith.constant 0 : index
    %8 = vector.load %arg7[%c0_7, %c0_8] : memref<64x256xf32, #tpu.memory_space<vmem>>, vector<64x256xf32>
    %9 = arith.maximumf %8, %4 : vector<64x256xf32>
    %c0_9 = arith.constant 0 : index
    %c0_10 = arith.constant 0 : index
    %10 = vector.load %arg7[%c0_9, %c0_10] : memref<64x256xf32, #tpu.memory_space<vmem>>, vector<64x256xf32>
    tpu.vector_store %arg7[%c0_9, %c0_10], %9 {strides = array<i32>} : memref<64x256xf32, #tpu.memory_space<vmem>>, vector<64x256xf32>,
    %c0_i32_11 = arith.constant 0 : i32
    %11 = arith.cmpi eq, %arg1, %c0_i32_11 : i32
    %12 = arith.extui %11 : i1 to i32
    %c0_i32_12 = arith.constant 0 : i32
    %13 = arith.cmpi ne, %12, %c0_i32_12 : i32
    scf.if %13 {
      %c0_13 = arith.constant 0 : index
      %c0_14 = arith.constant 0 : index
      %14 = vector.load %arg6[%c0_13, %c0_14] : memref<64x256xf32, #tpu.memory_space<vmem>>, vector<64x256xf32>
      %cst = arith.constant dense<0.000000e+00> : vector<64xf32>
      %15 = vector.multi_reduction <add>, %14, %cst [1] : vector<64x256xf32> to vector<64xf32>
      %c0_15 = arith.constant 0 : index
      %c0_16 = arith.constant 0 : index
      %16 = vector.load %arg7[%c0_15, %c0_16] : memref<64x256xf32, #tpu.memory_space<vmem>>, vector<64x256xf32>
      %cst_17 = arith.constant dense<0xFF800000> : vector<64xf32>
      %17 = vector.multi_reduction <maximumf>, %16, %cst_17 [1] : vector<64x256xf32> to vector<64xf32>
      %cst_18 = arith.constant 3.906250e-03 : f32
      %18 = vector.broadcast %cst_18 : f32 to vector<64xf32>
      %19 = arith.mulf %15, %18 : vector<64xf32>
      %20 = vector.shape_cast %19 : vector<64xf32> to vector<1x64xf32>
      %21 = vector.shape_cast %17 : vector<64xf32> to vector<1x64xf32>
      %22 = tpu.concatenate %20, %21 in 0 : vector<1x64xf32>, vector<1x64xf32> -> vector<2x64xf32>
      %c0_19 = arith.constant 0 : index
      %c0_20 = arith.constant 0 : index
      %23 = vector.load %arg3[%c0_19, %c0_20] : memref<64x8xf32, #tpu.memory_space<vmem>>, vector<64x8xf32>
      %cst_21 = arith.constant dense<0.000000e+00> : vector<2x8xf32>
      %24 = tpu.matmul %22, %23, %cst_21 {dimension_numbers = #tpu.dot_dimension_numbers<[1], [0], [0], [1], [0, 0, 1, 1], [], []>} : vector<2x64xf32>, vector<64x8xf32>, vector<2x8xf32> -> vector<2x8xf32>
      %cst_22 = arith.constant 0.000000e+00 : f32
      %25 = vector.broadcast %cst_22 : f32 to vector<2x8xf32>
      %26 = arith.maximumf %24, %25 : vector<2x8xf32>
      %c0_23 = arith.constant 0 : index
      %c0_24 = arith.constant 0 : index
      %27 = vector.load %arg4[%c0_23, %c0_24] : memref<8x64xf32, #tpu.memory_space<vmem>>, vector<8x64xf32>
      %cst_25 = arith.constant dense<0.000000e+00> : vector<2x64xf32>
      %28 = tpu.matmul %26, %27, %cst_25 {dimension_numbers = #tpu.dot_dimension_numbers<[1], [0], [0], [1], [0, 0, 1, 1], [], []>} : vector<2x8xf32>, vector<8x64xf32>, vector<2x64xf32> -> vector<2x64xf32>
      %29 = vector.extract_strided_slice %28 {offsets = [0, 0], sizes = [1, 64], strides = [1, 1]} : vector<2x64xf32> to vector<1x64xf32>
      %30 = vector.extract_strided_slice %28 {offsets = [1, 0], sizes = [1, 64], strides = [1, 1]} : vector<2x64xf32> to vector<1x64xf32>
      %31 = arith.addf %29, %30 : vector<1x64xf32>
      %32 = arith.negf %31 : vector<1x64xf32>
      %33 = math.exp %32 : vector<1x64xf32>
      %cst_26 = arith.constant 1.000000e+00 : f32
      %34 = vector.broadcast %cst_26 : f32 to vector<1x64xf32>
      %35 = arith.addf %34, %33 : vector<1x64xf32>
      %36 = arith.divf %34, %35 : vector<1x64xf32>
      %37 = vector.shape_cast %36 : vector<1x64xf32> to vector<1x1x64xf32>
      %c0_27 = arith.constant 0 : index
      %c0_28 = arith.constant 0 : index
      %c0_29 = arith.constant 0 : index
      %38 = vector.load %arg5[%c0_27, %c0_28, %c0_29] : memref<1x1x64xf32, #tpu.memory_space<vmem>>, vector<1x1x64xf32>
      tpu.vector_store %arg5[%c0_27, %c0_28, %c0_29], %37 {strides = array<i32>} : memref<1x1x64xf32, #tpu.memory_space<vmem>>, vector<1x1x64xf32>,
    } else {
    }
    return
  }
  func.func @transform_0(%arg0: i32, %arg1: i32) -> (i32, i32, i32) {
    %c0_i32 = arith.constant 0 : i32
    %c0_i32_0 = arith.constant 0 : i32
    return %arg0, %c0_i32, %arg1 : i32, i32, i32
  }
  func.func @transform_1(%arg0: i32, %arg1: i32) -> (i32, i32) {
    %c0_i32 = arith.constant 0 : i32
    %c0_i32_0 = arith.constant 0 : i32
    %c0_i32_1 = arith.constant 0 : i32
    return %c0_i32, %c0_i32_0 : i32, i32
  }
  func.func @transform_2(%arg0: i32, %arg1: i32) -> (i32, i32) {
    %c0_i32 = arith.constant 0 : i32
    %c0_i32_0 = arith.constant 0 : i32
    %c0_i32_1 = arith.constant 0 : i32
    return %c0_i32, %c0_i32_0 : i32, i32
  }
  func.func @transform_3(%arg0: i32, %arg1: i32) -> (i32, i32, i32) {
    %c0_i32 = arith.constant 0 : i32
    %c0_i32_0 = arith.constant 0 : i32
    %c0_i32_1 = arith.constant 0 : i32
    return %arg0, %c0_i32, %c0_i32_0 : i32, i32, i32
  }
}

</mosaic_0001>

<bundles_post_ra>
// kernel: channel_attention_pallas.1
= control target key start
LH: loop header
LB: loop body
LE: loop exit
PB: predicated region body
PF: predicated region fallthrough
CT: control target
= control target key end

     0   :  { %8 = vsyncpa [#allocation5], 0  ;;  %s1193_s0 = inlined_call_operand.vmem [shape: f32[2,64,256], index: 0, kind: input, shape index: {}]   ;;  %s1194_s1 = inlined_call_operand.vmem [shape: f32[64,8], index: 1, kind: input, shape index: {}]   ;;  %s1195_s2 = inlined_call_operand.vmem [shape: f32[8,64], index: 2, kind: input, shape index: {}]   ;;  %s1196_s3 = inlined_call_operand.hbm [shape: f32[2,1,64], index: 3, kind: output, shape index: {}]  }
   0x1   :  { %10 = vsyncpa [#allocation5 + $0x1], 0  ;;  %s1028_s12 = smov 0   ;;  %s1030_s13 = smov 0  }
   0x2   :  { %s1032_s14 = smov 0   ;;  %s1034_s15 = smov 0  }
   0x3   :  { %s1036_s16 = smov 0   ;;  %s1038_s17 = smov 0  }
   0x4 LB: > { %s801_s18 = sadd.s32 4294967295, %s1002_s17   ;;  %s802_s19 = sadd.s32 4294967294, %s1002_s17   ;;  %s1002_s17 = sphi %s1038_s17, %s16_s17   ;;  %s998_s16 = sphi %s1036_s16, %s1203_s16   ;;  %s994_s15 = sphi %s1034_s15, %s1202_s15   ;;  %s990_s14 = sphi %s1032_s14, %s1201_s14   ;;  %s986_s13 = sphi %s1030_s13, %s1200_s13   ;;  %s982_s12 = sphi %s1028_s12, %s1199_s12  }
   0x5   : > { %s28_s20 = sadd.s32 1, %s998_s16  ;;  %s105_s21 = sadd.s32 1, %s990_s14 }
   0x6   : > { %p30_p0 = scmp.ge.s32.totalorder %s28_s20, 2  ;;  %p115_p1 = scmp.ne.s32.totalorder %s990_s14, %s986_s13 }
   0x7   : > { %p116_p2 = scmp.eq.s32.totalorder %s801_s18, 1  ;;  %p121_p3 = scmp.ne.s32.totalorder %s986_s13, %s982_s12 }
   0x8   : > { %s1205_s20 = smov (%p30_p0, %s28_s20), 0  ;;  %p122_p5 = scmp.eq.s32.totalorder %s802_s19, 1 }
   0x9   : > { %p1068_p4 = por %p116_p2, %p115_p1  ;;  %s102_s23 = ssub.s32 %s998_s16, %s1205_s20 }
   0xa   : > { %p805_p6 = scmp.ge.s32.totalorder %s1002_s17, 1  ;;  %p103_p7 = scmp.eq.s32.totalorder %s102_s23, 0 }
   0xb   : > { %p1075_p8 = por %p122_p5, %p121_p3  ;;  %p159_p9 = scmp.lt.s32.totalorder %s1002_s17, 3 }
   0xc   : > { %s1081_s25 = scalar_select %p103_p7, %s990_s14, %s105_s21  }
   0xd   : > { %p160_p10 = pnand %p805_p6, %p159_p9 }
   0xe   : > { %p187_p11 = scmp.lt.s32.totalorder (!%p160_p10), %s994_s15, 1  ;;  %v549_v32 = vld [vmem:[%s1194_s1] sm:$0xff] (!%p160_p10)  ;;  %v550_v33 = vld [vmem:[%s1194_s1 + $0x8] sm:$0xff] (!%p160_p10)  ;;  %v1004_v35 = vmov (!%p160_p10), 0.0|0.0   ;;  %v551_v36 = vld [vmem:[%s1194_s1 + $0x10] sm:$0xff] (!%p160_p10)  ;;  %vm1005_vm0 = vmmov (!%p160_p10), 0   ;;  %v443_v49 = vlaneseq (!%p160_p10) }
   0xf   : > { %163 = sbr.rel (%p160_p10) target bundleno = 675 (0x2a3), region = 32  ;;  %v851_v34 = vpack.c.bf16 (!%p160_p10), %v550_v33, %v549_v32  ;;  %850 = vmatprep.subr.bf16.mxu0 (!%p160_p10), %v1004_v35  ;;  %v552_v37 = vld [vmem:[%s1194_s1 + $0x18] sm:$0xff] (!%p160_p10)  ;;  %v553_v39 = vld [vmem:[%s1194_s1 + $0x20] sm:$0xff] (!%p160_p10)  ;;  %v554_v40 = vld [vmem:[%s1194_s1 + $0x28] sm:$0xff] (!%p160_p10)  ;;  %v1006_v45 = vmov (!%p160_p10), 0.0   ;;  %vm454_vm1 = vcmask (!%p160_p10), 130112  }
  0x10   : > { %v854_v38 = vpack.c.bf16 (!%p160_p10), %v552_v37, %v551_v36  ;;  %v857_v41 = vpack.c.bf16 (!%p160_p10), %v554_v40, %v553_v39  ;;  %v555_v42 = vld [vmem:[%s1194_s1 + $0x30] sm:$0xff] (!%p160_p10)  ;;  %v556_v43 = vld [vmem:[%s1194_s1 + $0x38] sm:$0xff] (!%p160_p10)  ;;  %842 = vmatprep.mubr.msk.f32.mxu0 (!%p160_p10), %vm1005_vm0, %v1006_v45  ;;  %845 = vmatprep.subr.mxu1 (!%p160_p10), %v1006_v45  ;;  %v444_v52 = vand.u32 (!%p160_p10), 127, %v443_v49  ;;  %v446_v56 = vshrl.u32 (!%p160_p10), %v443_v49, 7  ;;  %s184_s5 = sand.u32 (!%p160_p10), 1, %s986_s13   ;;  %s811_s6 = sshll.u32 (!%p160_p10), %s994_s15, 4 }
  0x11   : > { %852 = vmatpush3.bf16.msra.mxu0 (!%p160_p10), %v851_v34  ;;  %v860_v44 = vpack.c.bf16 (!%p160_p10), %v556_v43, %v555_v42  ;;  %847 = vmatprep.mubr.msk.f32.mxu1 (!%p160_p10), %vm1005_vm0, %v1006_v45  ;;  %vm461_vm2 = vcmask (!%p160_p10), 195712   ;;  %vm468_vm3 = vcmask (!%p160_p10), 261312   ;;  %vm475_vm4 = vcmask (!%p160_p10), 326912   ;;  %s185_s7 = scalar_lea.vmem (!%p160_p10), [#allocation4], %s184_s5  ;;  %s1146_s11 = scalar_lea.hbm (!%p160_p10), %s1196_s3, %s811_s6 }
  0x12   : > { %853 = vmatprep.subr.bf16.mxu0 (!%p160_p10), %v1004_v35  ;;  %v449_v54 = vadd.s32 (!%p160_p10), 4294967288, %v444_v52  ;;  %v456_v60 = vadd.s32 (!%p160_p10), 4294967280, %v444_v52  ;;  %v447_v62 = vsub.s32 (!%p160_p10), %v444_v52, %v446_v56  ;;  %vm482_vm5 = vcmask (!%p160_p10), 392512   ;;  %s732_s8 = sshll.u32 (!%p160_p10), %s185_s7, 4  ;;  %s720_s18 = scalar_lea.sflag (!%p160_p10), [#allocation5], %s184_s5  ;;  %s1148_s8 = int_to_ptr.vmem [resolvable:$true] %s732_s8 }
  0x13   : > { %vm489_vm6 = vcmask (!%p160_p10), 458112   ;;  %vm496_vm7 = vcmask (!%p160_p10), 523712   ;;  %vm547_vm8 = vcmask (!%p160_p10), 1040384   ;;  %vm557_vm9 = vcmask (!%p160_p10), 523264   ;;  %s924_s19 = scalar_lea.vmem (!%p160_p10), %s1148_s8, 16 }
  0x14   : > { %v452_v58 = vsub.s32 (!%p160_p10), %v449_v54, %v446_v56  ;;  %vm633_vm10 = vcmask (!%p160_p10), 64512   ;;  %vm717_vm11 = vcmask (!%p160_p10), 516096   ;;  %p925_p12 = scmp.ne.s32.totalorder (!%p160_p10), %s1148_s8, %s924_s19 }
  0x15   : > { %855 = vmatpush3.bf16.msra.mxu0 (!%p160_p10), %v854_v38 }
  0x16   : > { %s188_s26 = scalar_select %p187_p11, %s994_s15, 1  ;;  %856 = vmatprep.subr.bf16.mxu0 %v1004_v35 }
  0x17   : > { %p926_p13 = pnand %p925_p12, %p1068_p4  ;;  %s1007_s15 = smov [#allocation4]  }
  0x18   : > { %s814_s27 = sshll.u32 %s188_s26, 7  ;;  %s928_s21 = sshll.u32 %s1007_s15, 4  ;;  %s929_s21 = int_to_ptr.vmem [resolvable:$false] %s928_s21 }
  0x19   : > { %s1088_s30 = scalar_lea.vmem %s1193_s0, %s814_s27  ;;  %858 = vmatpush3.bf16.msra.mxu0 %v857_v41  ;;  %p927_p0 = pneg %p926_p13 }
  0x1a   : > { %v236_v0 = vld [vmem:[%s1088_s30 + $0x20] sm:$0xff]  ;;  %v237_v1 = vld [vmem:[%s1088_s30 + $0x28] sm:$0xff]  ;;  %v238_v5 = vld [vmem:[%s1088_s30 + $0x30] sm:$0xff]  ;;  %859 = vmatprep.subr.bf16.mxu0 %v1004_v35  ;;  %s930_s23 = scalar_lea.vmem %s929_s21, 32  ;;  %p931_p1 = scmp.lt.s32.totalorder %s1148_s8, %s929_s21 }
  0x1b   : > { %v232_v2 = vld [vmem:[%s1088_s30] sm:$0xff]  ;;  %v369_v3 = vadd.f32 %v237_v1, %v236_v0  ;;  %v233_v4 = vld [vmem:[%s1088_s30 + $0x8] sm:$0xff]  ;;  %v239_v6 = vld [vmem:[%s1088_s30 + $0x38] sm:$0xff]  ;;  %v409_v16 = vmax.f32 %v236_v0, %v237_v1  ;;  %v463_v0 = vadd.s32 4294967272, %v444_v52  ;;  %p932_p2 = scmp.lt.s32.totalorder %s930_s23, %s924_s19 }
  0x1c   : > { %v363_v7 = vadd.f32 %v233_v4, %v232_v2  ;;  %v234_v8 = vld [vmem:[%s1088_s30 + $0x10] sm:$0xff]  ;;  %v235_v9 = vld [vmem:[%s1088_s30 + $0x18] sm:$0xff]  ;;  %v372_v10 = vadd.f32 %v239_v6, %v238_v5  ;;  %v403_v13 = vmax.f32 %v232_v2, %v233_v4  ;;  %v240_v14 = vld [vmem:[%s1088_s30 + $0x40] sm:$0xff]  ;;  %v412_v20 = vmax.f32 %v238_v5, %v239_v6 }
  0x1d   : > { %370 = vadd.xlane.f32.xlu1 %v369_v3  ;;  %v366_v11 = vadd.f32 %v235_v9, %v234_v8  ;;  %v406_v12 = vmax.f32 %v234_v8, %v235_v9  ;;  %v241_v15 = vld [vmem:[%s1088_s30 + $0x48] sm:$0xff]  ;;  %v242_v18 = vld [vmem:[%s1088_s30 + $0x50] sm:$0xff]  ;;  %v243_v19 = vld [vmem:[%s1088_s30 + $0x58] sm:$0xff]  ;;  %861 = vmatpush3.bf16.msra.mxu0 %v860_v44  ;;  %v470_v2 = vadd.s32 4294967264, %v444_v52  ;;  %v477_v3 = vadd.s32 4294967256, %v444_v52  ;;  %p933_p3 = por %p932_p2, %p931_p1 }
  0x1e   : > { %364 = vadd.xlane.f32.xlu0 %v363_v7  ;;  %v375_v17 = vadd.f32 %v241_v15, %v240_v14  ;;  %v378_v21 = vadd.f32 %v243_v19, %v242_v18  ;;  %v244_v22 = vld [vmem:[%s1088_s30 + $0x60] sm:$0xff]  ;;  %v245_v23 = vld [vmem:[%s1088_s30 + $0x68] sm:$0xff]  ;;  %v415_v24 = vmax.f32 %v240_v14, %v241_v15  ;;  %v246_v26 = vld [vmem:[%s1088_s30 + $0x70] sm:$0xff]  ;;  %v418_v28 = vmax.f32 %v242_v18, %v243_v19 }
  0x1f   : > { %v381_v25 = vadd.f32 %v245_v23, %v244_v22  ;;  %v247_v27 = vld [vmem:[%s1088_s30 + $0x78] sm:$0xff]  ;;  %v421_v31 = vmax.f32 %v244_v22, %v245_v23  ;;  %v459_v5 = vsub.s32 %v456_v60, %v446_v56  ;;  %v484_v8 = vadd.s32 4294967248, %v444_v52  ;;  %p934_p5 = pnand %p933_p3, %p927_p0 }
  0x20   : > { %v384_v29 = vadd.f32 %v247_v27, %v246_v26  ;;  %v424_v30 = vmax.f32 %v246_v26, %v247_v27  ;;  %v473_v14 = vsub.s32 %v470_v2, %v446_v56 }
  0x21   : > { %373 = vadd.xlane.f32.xlu1 %v372_v10  ;;  %v466_v10 = vsub.s32 %v463_v0, %v446_v56  ;;  %v487_v23 = vsub.s32 %v484_v8, %v446_v56 }
  0x22   : > { %367 = vadd.xlane.f32.xlu0 %v366_v11 }
  0x25   : > { %407 = vmax.xlane.f32.xlu1 %v406_v12 }
  0x26   : > { %404 = vmax.xlane.f32.xlu0 %v403_v13  ;;  %v491_v13 = vadd.s32 4294967240, %v444_v52 }
  0x29   : > { %410 = vmax.xlane.f32.xlu1 %v409_v16  ;;  %v480_v16 = vsub.s32 %v477_v3, %v446_v56 }
  0x2a   : > { %376 = vadd.xlane.f32.xlu0 %v375_v17 }
  0x2d   : > { %413 = vmax.xlane.f32.xlu1 %v412_v20 }
  0x2e   : > { %379 = vadd.xlane.f32.xlu0 %v378_v21 }
  0x31   : > { %416 = vmax.xlane.f32.xlu1 %v415_v24 }
  0x32   : > { %382 = vadd.xlane.f32.xlu0 %v381_v25 }
  0x35   : > { %419 = vmax.xlane.f32.xlu1 %v418_v28  ;;  %v494_v28 = vsub.s32 %v491_v13, %v446_v56 }
  0x36   : > { %385 = vadd.xlane.f32.xlu0 %v384_v29 }
  0x39   : > { %425 = vmax.xlane.f32.xlu1 %v424_v30 }
  0x3a   : > { %422 = vmax.xlane.f32.xlu0 %v421_v31 }
  0xaa   : > { %v371_v46 = vpop.xlane.xlu1 %370 }
  0xab   : > { %v365_v47 = vpop.xlane.xlu0 %364  ;;  %v429_v6 = vmul.f32 0.00390625, %v371_v46 }
  0xac   : > { %v427_v63 = vmul.f32 0.00390625, %v365_v47 }
  0xad   : > { %v460_v21 = vrot.slane %v429_v6, %v459_v5 }
  0xae   : > { %v374_v48 = vpop.xlane.xlu1 %373  ;;  %v448_v9 = vrot.slane %v427_v63, %v447_v62 }
  0xaf   : > { %v368_v50 = vpop.xlane.xlu0 %367  ;;  %v430_v11 = vmul.f32 0.00390625, %v374_v48 }
  0xb0   : > { %v428_v59 = vmul.f32 0.00390625, %v368_v50 }
  0xb1   : > { %v467_v26 = vrot.slane %v430_v11, %v466_v10 }
  0xb2   : > { %v408_v51 = vpop.xlane.xlu1 %407  ;;  %v453_v4 = vrot.slane %v428_v59, %v452_v58 }
  0xb3   : > { %v405_v53 = vpop.xlane.xlu0 %404  ;;  %v514_v18 = vrot.slane %v408_v51, %v452_v58 }
  0xb4   : > { %v455_v17 = vsel %vm454_vm1, %v453_v4, %v448_v9  ;;  %v510_v19 = vrot.slane %v405_v53, %v447_v62 }
  0xb5   : > { %v462_v30 = vsel %vm461_vm2, %v460_v21, %v455_v17 }
  0xb6   : > { %v411_v55 = vpop.xlane.xlu1 %410  ;;  %v515_v34 = vsel %vm454_vm1, %v514_v18, %v510_v19  ;;  %v469_v40 = vsel %vm468_vm3, %v467_v26, %v462_v30 }
  0xb7   : > { %v377_v57 = vpop.xlane.xlu0 %376  ;;  %v519_v22 = vrot.slane %v411_v55, %v459_v5  ;;  %v632_v55 = vld [vmem:[%s1195_s2] sm:$0xff] }
  0xb8   : > { %v431_v15 = vmul.f32 0.00390625, %v377_v57  ;;  %846 = vmatpush3.msra.mxu1 %v632_v55 }
  0xb9   : > { %v520_v37 = vsel %vm461_vm2, %v519_v22, %v515_v34 }
  0xba   : > { %v414_v61 = vpop.xlane.xlu1 %413  ;;  %v474_v31 = vrot.slane %v431_v15, %v473_v14 }
  0xbb   : > { %v380_v1 = vpop.xlane.xlu0 %379  ;;  %v524_v27 = vrot.slane %v414_v61, %v466_v10 }
  0xbc   : > { %v432_v20 = vmul.f32 0.00390625, %v380_v1  ;;  %v476_v45 = vsel %vm475_vm4, %v474_v31, %v469_v40 }
  0xbd   : > { %v525_v41 = vsel %vm468_vm3, %v524_v27, %v520_v37 }
  0xbe   : > { %v417_v7 = vpop.xlane.xlu1 %416  ;;  %v481_v35 = vrot.slane %v432_v20, %v480_v16 }
  0xbf   : > { %v383_v12 = vpop.xlane.xlu0 %382  ;;  %v529_v32 = vrot.slane %v417_v7, %v473_v14 }
  0xc0   : > { %v433_v24 = vmul.f32 0.00390625, %v383_v12  ;;  %v483_v48 = vsel %vm482_vm5, %v481_v35, %v476_v45 }
  0xc1   : > { %v530_v46 = vsel %vm475_vm4, %v529_v32, %v525_v41 }
  0xc2   : > { %v420_v25 = vpop.xlane.xlu1 %419  ;;  %v488_v38 = vrot.slane %v433_v24, %v487_v23 }
  0xc3   : > { %v386_v29 = vpop.xlane.xlu0 %385  ;;  %v534_v36 = vrot.slane %v420_v25, %v480_v16 }
  0xc4   : > { %v434_v33 = vmul.f32 0.00390625, %v386_v29  ;;  %v490_v50 = vsel %vm489_vm6, %v488_v38, %v483_v48 }
  0xc5   : > { %v535_v49 = vsel %vm482_vm5, %v534_v36, %v530_v46 }
  0xc6   : > { %v426_v39 = vpop.xlane.xlu1 %425  ;;  %v495_v42 = vrot.slane %v434_v33, %v494_v28 }
  0xc7   : > { %v423_v43 = vpop.xlane.xlu0 %422  ;;  %v544_v44 = vrot.slane %v426_v39, %v494_v28 }
  0xc8   : > { %v539_v47 = vrot.slane %v423_v43, %v487_v23  ;;  %v497_v53 = vsel %vm496_vm7, %v495_v42, %v490_v50 }
  0xca   : > { %v540_v51 = vsel %vm489_vm6, %v539_v47, %v535_v49 }
  0xcb   : > { %v545_v52 = vsel %vm496_vm7, %v544_v44, %v540_v51 }
  0xcc   : > { %v548_v54 = vsel %vm547_vm8, %v497_v53, %v545_v52 }
  0xcd   : > { %843 = vmatmul.mubr.msk.f32.vlgmr.msra.gmra.mrb[0].mxu0 %vm557_vm9, %v548_v54 }
 0x1a0   : > { %v627_v56 = vpop.f32.mrb[0].mxu0 }
 0x1a1   : > { %v631_v57 = vmax.f32 %v627_v56, 0.0  ;;  %v844_v58 = vpop.f32.mrb[1].mxu0 }
 0x1a3   : > { %848 = vmatmul.mubr.msk.f32.vlgmr.msra.gmra.mrb[0].mxu1 %vm633_vm10, %v631_v57 }
 0x276   : > { %v703_v59 = vpop.f32.mrb[0].mxu1 }
 0x277   : > { %v708_v60 = vrot.slane %v703_v59, 1  ;;  %v849_v61 = vpop.f32.mrb[1].mxu1 }
 0x279   : > { %v710_v62 = vadd.f32 %v708_v60, %v703_v59 }
 0x27b   : > { %v810_v63 = vmul.f32 -1.442695, %v710_v62 }
 0x27d   : > { %920 = vpow2.f32 %v810_v63 }
 0x287   : > { %v921_v0 = vpop.eup %920 }
 0x288   : > { %v714_v1 = vadd.f32 1.0, %v921_v0 }
 0x28a   : > { %922 = vrcp.f32 %v714_v1 }
 0x294   : > { %v923_v2 = vpop.eup %922 }
 0x295   : > { %718 = vst.msk [vmem:[%s185_s7] sm:$0x1] %vm717_vm11, %v923_v2 }
 0x296   : > { %937 = shalt.err (!%p934_p5)
}
 0x297   : > { %s938_s26 = scalar_lea.hbm %s1146_s11, 16  ;;  %s942_s29 = scalar_lea.hbm %s1196_s3, 32 }
 0x298   : > { %p939_p6 = scmp.ne.s32.totalorder %s1146_s11, %s938_s26  ;;  %p943_p10 = scmp.lt.u32.totalorder %s1146_s11, %s1196_s3 }
 0x299   : > { %p944_p11 = scmp.lt.u32.totalorder %s942_s29, %s938_s26  ;;  %p946_p13 = scmp.lt.u32.totalorder %s938_s26, %s1146_s11 }
 0x29a   : > { %p940_p7 = pnand %p939_p6, %p1068_p4 }
 0x29b   : > { %p945_p12 = por %p944_p11, %p943_p10 }
 0x29c   : > { %p941_p9 = pneg %p940_p7 }
 0x29d   : > { %p947_p0 = por %p946_p13, %p945_p12 }
 0x29f   : > { %p948_p1 = pnand %p947_p0, %p941_p9 }
 0x2a1   : > { %951 = shalt.err (!%p948_p1)
}
 0x2a2   : > { %862 = dma.vmem_to_hbm [thread:$0]  (%p1068_p4), %s1148_s8, 16, %s1146_s11, %s720_s18  }
 0x2a3 PF: > { %p868_p2 = scmp.ge.s32.totalorder %s1002_s17, 2  ;;  %s744_s5 = sand.u32 1, %s982_s12  }
 0x2a4   : > { %s745_s6 = scalar_lea.sflag [#allocation5], %s744_s5 }
 0x2a5   : > { %p865_p3 = pnand %p868_p2, %p1075_p8 }
 0x2a7   : > { %977 = dma.done.wait (!%p865_p3), %s745_s6, 16  }
 0x2a8   : > { %979 = vsyncadd (!%p865_p3), %s745_s6, 4294967280  ;;  %s16_s17 = sadd.s32 1, %s1002_s17   ;;  %s1199_s12 = smov %s986_s13 }
 0x2a9   : > { %p13_p5 = scmp.ge.s32.totalorder %s16_s17, 4   ;;  %s1200_s13 = smov %s990_s14 }
 0x2aa   : > { %s1201_s14 = smov %s1081_s25  ;;  %s1202_s15 = smov %s998_s16 }
 0x2ab   : > { %s1203_s16 = smov %s1205_s20  ;;  %15 = sbr.rel (!%p13_p5) target bundleno = 4 (0x4), region = 75 }
 0x2b2   :  { %749 = vsyncpa [#allocation5], 1 }
 0x2b3   :  { %751 = vsyncpa [#allocation5 + $0x1], 1 }

</bundles_post_ra>
